<compile_context>
chip_gen: v7x
topology: tpu7x:2x2x1
jax: 0.10.0
libtpu: 0.0.40
codegen_flags: <defaults>
</compile_context>

<pallas_src>
import functools

import jax
import jax.numpy as jnp
import numpy as np
from jax.experimental import pallas as pl
from jax.experimental.pallas import tpu as pltpu


# --------------------------------------------------------------------------- #
# Kernels
# --------------------------------------------------------------------------- #
def _fused_kernel(x_ref, w_ref, o_ref):
    # x_ref: (b_tile, num_blocks*d_in)  lane-packed input tile
    # w_ref: (num_blocks*d_in, num_blocks*d_out)  block-diagonal weight (resident)
    # o_ref: (b_tile, num_blocks*d_out) lane-packed output tile
    o_ref[...] = jnp.dot(
        x_ref[...], w_ref[...], preferred_element_type=jnp.float32
    ).astype(o_ref.dtype)


def _grouped_kernel(x_ref, w_ref, o_ref, *, num_blocks, d_in, d_out):
    # Fallback for shapes where the block-diagonal weight would be wasteful.
    # x_ref: (b_tile, num_blocks*d_in); w_ref: (num_blocks, d_in, d_out);
    # o_ref: (b_tile, num_blocks*d_out).  Direct per-group stores: no list of
    # live partial tiles, no jnp.concatenate.
    for n in range(num_blocks):  # static unroll; num_blocks is small in RIMs
        xn = x_ref[:, n * d_in:(n + 1) * d_in]
        yn = jnp.dot(xn, w_ref[n], preferred_element_type=jnp.float32)
        o_ref[:, n * d_out:(n + 1) * d_out] = yn.astype(o_ref.dtype)


# --------------------------------------------------------------------------- #
# Sizing helpers
# --------------------------------------------------------------------------- #
def _vmem_capacity_bytes():
    try:
        info = pltpu.get_tpu_info()
        cap = getattr(info, "vmem_capacity_bytes", None)
        if cap:
            return int(cap)
    except Exception:
        pass
    return 64 * 1024 * 1024  # conservative per-core default (v7x)


def _sublane_multiple(dtype):
    # f32 -> 8 rows/sublane-tile, bf16 -> 16, int8/fp8 -> 32.
    return {4: 8, 2: 16, 1: 32}.get(jnp.dtype(dtype).itemsize, 8)


def _round_down(v, m):
    return max(m, (v // m) * m)


def _round_up(v, m):
    return ((v + m - 1) // m) * m


def _pick_batch_tile(batch, fixed_bytes, row_bytes, sublane, max_batch_tile,
                     budget_bytes):
    if batch <= sublane:
        return batch  # full-dim block is always legal
    avail = max(budget_bytes - fixed_bytes, sublane * row_bytes)
    tile = min(batch, max_batch_tile, avail // row_bytes)
    tile = _round_down(int(tile), sublane)
    # Keep at least 2 grid steps when possible: lets ("parallel",) shard the
    # batch axis across v7x's two TensorCores and overlaps DMA with compute.
    tile = min(tile, _round_up(pl.cdiv(batch, 2), sublane))
    return max(tile, sublane)


def _block_diag_weight(weight):
    # (num_blocks, d_in, d_out) -> (num_blocks*d_in, num_blocks*d_out) with the
    # per-group matrices on the diagonal.  Built once in the wrapper (tiny for
    # RIMs shapes); lane-dense last dim -> efficient MXU RHS + no lane padding.
    num_blocks, d_in, d_out = weight.shape
    eye = jnp.eye(num_blocks, dtype=weight.dtype)
    w_bd = jnp.einsum("nio,nm->nimo", weight, eye)
    return w_bd.reshape(num_blocks * d_in, num_blocks * d_out)


# --------------------------------------------------------------------------- #
# Wrapper
# --------------------------------------------------------------------------- #
def group_linear_layer(x, weight, *, max_batch_tile=2048, force_grouped=False):
    """x: (batch, num_blocks, input_dim); weight: (num_blocks, input_dim, output_dim)."""
    batch, num_blocks, d_in = x.shape
    nw, d_in_w, d_out = weight.shape
    assert num_blocks == nw and d_in == d_in_w

    out_dtype = x.dtype
    xi = jnp.dtype(x.dtype).itemsize
    wi = jnp.dtype(weight.dtype).itemsize
    oi = jnp.dtype(out_dtype).itemsize
    sub = _sublane_multiple(x.dtype)

    capacity = _vmem_capacity_bytes()
    budget = capacity // 2           # working budget for tile sizing
    limit_cap = (capacity * 3) // 4  # leave headroom for compiler scratch

    K = num_blocks * d_in
    N = num_blocks * d_out

    # Lane-packed 2-D views are free, contiguous reshapes (no HBM transpose).
    x2 = x.reshape(batch, K)

    w_bd_bytes = K * N * wi
    use_fused = (not force_grouped) and (
        num_blocks == 1 or 2 * w_bd_bytes <= budget // 4)

    if use_fused:
        w_bd = _block_diag_weight(weight)
        row_bytes = 2 * (K * xi + N * oi) + N * 4       # dbl-buffered io + f32 result
        fixed_bytes = 2 * w_bd_bytes                    # resident weight (dbl-buffered)
        b_tile = _pick_batch_tile(batch, fixed_bytes, row_bytes, sub,
                                  max_batch_tile, budget)
        grid_b = pl.cdiv(batch, b_tile)

        vmem_needed = (2 * b_tile * (K * xi + N * oi) + 2 * w_bd_bytes
                       + b_tile * N * 4)
        vmem_limit = int(min(max(2 * vmem_needed, 32 * 1024 * 1024), limit_cap))

        out2 = pl.pallas_call(
            _fused_kernel,
            out_shape=jax.ShapeDtypeStruct((batch, N), out_dtype),
            grid_spec=pltpu.PrefetchScalarGridSpec(
                num_scalar_prefetch=0,
                grid=(grid_b,),
                in_specs=[
                    pl.BlockSpec((b_tile, K), lambda i: (i, 0)),
                    pl.BlockSpec((K, N), lambda i: (0, 0)),
                ],
                out_specs=pl.BlockSpec((b_tile, N), lambda i: (i, 0)),
            ),
            compiler_params=pltpu.CompilerParams(
                dimension_semantics=("parallel",),
                vmem_limit_bytes=vmem_limit,
            ),
            cost_estimate=pl.CostEstimate(
                flops=2 * batch * K * N, transcendentals=0,
                bytes_accessed=batch * K * xi + w_bd_bytes + batch * N * oi),
        )(x2, w_bd)
        return out2.reshape(batch, num_blocks, d_out)

    # ---------------- grouped fallback (large d_in/d_out) ------------------ #
    # TODO(synk): for weights too large to stay resident in VMEM
    # (2*num_blocks*d_in*d_out bytes > budget), add a second grid axis over
    # groups instead of keeping the whole 3-D weight resident.
    w_bytes = num_blocks * d_in * d_out * wi
    row_bytes = 2 * (K * xi + N * oi) + d_out * 4       # one group's f32 result live
    fixed_bytes = 2 * w_bytes
    b_tile = _pick_batch_tile(batch, fixed_bytes, row_bytes, sub,
                              max_batch_tile, budget)
    grid_b = pl.cdiv(batch, b_tile)

    vmem_needed = 2 * b_tile * (K * xi + N * oi) + 2 * w_bytes + b_tile * d_out * 4
    vmem_limit = int(min(max(2 * vmem_needed, 32 * 1024 * 1024), limit_cap))

    kernel = functools.partial(_grouped_kernel, num_blocks=num_blocks,
                               d_in=d_in, d_out=d_out)
    out2 = pl.pallas_call(
        kernel,
        out_shape=jax.ShapeDtypeStruct((batch, N), out_dtype),
        grid_spec=pltpu.PrefetchScalarGridSpec(
            num_scalar_prefetch=0,
            grid=(grid_b,),
            in_specs=[
                pl.BlockSpec((b_tile, K), lambda i: (i, 0)),
                pl.BlockSpec((num_blocks, d_in, d_out), lambda i: (0, 0, 0)),
            ],
            out_specs=pl.BlockSpec((b_tile, N), lambda i: (i, 0)),
        ),
        compiler_params=pltpu.CompilerParams(
            dimension_semantics=("parallel",),
            vmem_limit_bytes=vmem_limit,
        ),
        cost_estimate=pl.CostEstimate(
            flops=2 * batch * num_blocks * d_in * d_out, transcendentals=0,
            bytes_accessed=batch * K * xi + w_bytes + batch * N * oi),
    )(x2, weight)
    return out2.reshape(batch, num_blocks, d_out)


# --------------------------------------------------------------------------- #
# Self-test
# --------------------------------------------------------------------------- #
if __name__ == "__main__":
    # Small shapes consistent with the module (RIMs-style).
    batch, num_blocks, input_dim, output_dim = 128, 4, 32, 32

    key = jax.random.PRNGKey(0)
    kx, kw = jax.random.split(key)
    x = jax.random.normal(kx, (batch, num_blocks, input_dim), dtype=jnp.float32)
    # Deterministic init matching reset_parameters: N(0, sqrt(2/(2*input_dim)))
    std = float(np.sqrt(2.0 / (input_dim * 2)))
    weight = std * jax.random.normal(
        kw, (num_blocks, input_dim, output_dim), dtype=jnp.float32)

    ref = jnp.einsum("bnd,ndo->bno", x, weight)

    # Default fused block-diagonal path (>=2 batch tiles on the parallel axis).
    out = jax.block_until_ready(group_linear_layer(x, weight))
    np.testing.assert_allclose(np.asarray(out), np.asarray(ref),
                               rtol=1e-5, atol=1e-5)

    # Fused path with a ragged tail (cdiv grid: 128 = 48 + 48 + 32).
    out_ragged = jax.block_until_ready(
        group_linear_layer(x, weight, max_batch_tile=48))
    np.testing.assert_allclose(np.asarray(out_ragged), np.asarray(ref),
                               rtol=1e-5, atol=1e-5)

    # Grouped fallback path (per-group matmuls, direct per-group stores).
    out_grouped = jax.block_until_ready(
        group_linear_layer(x, weight, force_grouped=True))
    np.testing.assert_allclose(np.asarray(out_grouped), np.asarray(ref),
                               rtol=1e-5, atol=1e-5)

    print("KERNEL_OK")
</pallas_src>

<mosaic_0001>
module attributes {stable_mosaic.version = 11 : i64} {
  func.func @_fused_kernel(%arg0: i32, %arg1: memref<64x128xf32, #tpu.memory_space<vmem>>, %arg2: memref<128x128xf32, #tpu.memory_space<vmem>>, %arg3: memref<64x128xf32, #tpu.memory_space<vmem>>) attributes {dimension_semantics = [#tpu.dimension_semantics<parallel>], iteration_bounds = array<i64: 2>, scalar_prefetch = 0 : i64, scratch_operands = 0 : i64, tpu.core_type = #tpu.core_type<tc>, window_params = [{transform_indices = @transform_0, window_bounds = array<i64: 64, 128>}, {pipeline_mode = #tpu.pipeline_mode<synchronous>, transform_indices = @transform_1, window_bounds = array<i64: 128, 128>}, {transform_indices = @transform_2, window_bounds = array<i64: 64, 128>}]} {
    %c0 = arith.constant 0 : index
    %c0_0 = arith.constant 0 : index
    %0 = vector.load %arg1[%c0, %c0_0] : memref<64x128xf32, #tpu.memory_space<vmem>>, vector<64x128xf32>
    %c0_1 = arith.constant 0 : index
    %c0_2 = arith.constant 0 : index
    %1 = vector.load %arg2[%c0_1, %c0_2] : memref<128x128xf32, #tpu.memory_space<vmem>>, vector<128x128xf32>
    %cst = arith.constant dense<0.000000e+00> : vector<64x128xf32>
    %2 = tpu.matmul %0, %1, %cst {dimension_numbers = #tpu.dot_dimension_numbers<[1], [0], [0], [1], [0, 0, 1, 1], [], []>} : vector<64x128xf32>, vector<128x128xf32>, vector<64x128xf32> -> vector<64x128xf32>
    %c0_3 = arith.constant 0 : index
    %c0_4 = arith.constant 0 : index
    %3 = vector.load %arg3[%c0_3, %c0_4] : memref<64x128xf32, #tpu.memory_space<vmem>>, vector<64x128xf32>
    tpu.vector_store %arg3[%c0_3, %c0_4], %2 {strides = array<i32>} : memref<64x128xf32, #tpu.memory_space<vmem>>, vector<64x128xf32>,
    return
  }
  func.func @transform_0(%arg0: i32) -> (i32, i32) {
    %c0_i32 = arith.constant 0 : i32
    %c0_i32_0 = arith.constant 0 : i32
    return %arg0, %c0_i32 : i32, i32
  }
  func.func @transform_1(%arg0: i32) -> (i32, i32) {
    %c0_i32 = arith.constant 0 : i32
    %c0_i32_0 = arith.constant 0 : i32
    %c0_i32_1 = arith.constant 0 : i32
    return %c0_i32, %c0_i32_0 : i32, i32
  }
  func.func @transform_2(%arg0: i32) -> (i32, i32) {
    %c0_i32 = arith.constant 0 : i32
    %c0_i32_0 = arith.constant 0 : i32
    return %arg0, %c0_i32 : i32, i32
  }
}

</mosaic_0001>

<bundles_post_ra>
// kernel: tpu_custom_call.1
= control target key start
LH: loop header
LB: loop body
LE: loop exit
PB: predicated region body
PF: predicated region fallthrough
CT: control target
= control target key end

     0   :  { %7 = vsyncpa [#allocation3], 0  ;;  %s981_s0 = inlined_call_operand.hbm [shape: f32[128,128], index: 0, kind: input, shape index: {}]   ;;  %s982_s1 = inlined_call_operand.hbm [shape: f32[128,128], index: 1, kind: input, shape index: {}]   ;;  %s983_s2 = inlined_call_operand.hbm [shape: f32[128,128], index: 2, kind: output, shape index: {}]  }
   0x1   :  { %9 = vsyncpa [#allocation3 + $0x1], 0 }
   0x2   :  { %10 = vsyncpa [#allocation6], 0 }
   0x3   :  { %11 = vsyncpa [#allocation4], 0 }
   0x4   :  { %13 = vsyncpa [#allocation4 + $0x1], 0  ;;  %s760_s9 = smov 0   ;;  %s762_s10 = smov 0  }
   0x5   :  { %s764_s11 = smov 0   ;;  %s766_s12 = smov 0  }
   0x6 LB: > { %s781_s13 = sadd.s32 4294967295, %s736_s12   ;;  %s413_s14 = sadd.s32 4294967294, %s736_s12   ;;  %s736_s12 = sphi %s766_s12, %s1003_s12   ;;  %s732_s11 = sphi %s764_s11, %s1002_s11   ;;  %s728_s10 = sphi %s762_s10, %s1001_s10   ;;  %s724_s9 = sphi %s760_s9, %s1000_s9  }
   0x7   : > { %p39_p0 = scmp.ne.s32.totalorder %s728_s10, %s724_s9  ;;  %p984_p1 = scmp.eq.s32.totalorder %s781_s13, 0 }
   0x8   : > { %p90_p3 = scmp.eq.s32.totalorder %s413_s14, 1  ;;  %p414_p5 = scmp.ge.s32.totalorder %s736_s12, 1 }
   0x9   : > { %p790_p4 = por %p984_p1, %p39_p0  ;;  %p97_p7 = scmp.lt.s32.totalorder %s736_s12, 3 }
   0xa   : > { %p795_p6 = por %p90_p3, %p39_p0  ;;  %s738_s18 = smov [#allocation5]  }
   0xb   : > { %s987_s15 = scalar_select %p790_p4, 1, 0 }
   0xc   : > { %s988_s16 = scalar_select %p795_p6, 1, 0 }
   0xd   : > { %p800_p8 = pnand %p414_p5, %p97_p7  ;;  %s109_s19 = sshll.u32 %s738_s18, 4  ;;  %s804_s19 = int_to_ptr.vmem [resolvable:$true] %s109_s19 }
   0xe   : > { %s816_s21 = sadd.s32 1, %s736_s12   ;;  %s26_s22 = sadd.s32 1, %s732_s11 }
   0xf   : > { %s989_s17 = scalar_select %p800_p8, 1, 0 }
  0x10   : > { %p555_p9 = pneg %p800_p8  ;;  %s23_s23 = ssub.s32 %s736_s12, %s816_s21 }
  0x11   : > { %s608_s26 = scalar_lea.hbm %s982_s1, 2048 }
  0x12   : > { %p811_p11 = pnand %p555_p9, %p984_p1  ;;  %p609_p12 = scmp.ne.s32.totalorder %s982_s1, %s608_s26 }
  0x13   : > { %p615_p5 = scmp.lt.u32.totalorder %s608_s26, %s982_s1 }
  0x14   : > { %p610_p13 = pneg %p811_p11 }
  0x16   : > { %p611_p0 = pnand %p610_p13, %p609_p12 }
  0x18   : > { %p612_p3 = pneg %p611_p0 }
  0x1a   : > { %p617_p7 = pnand %p615_p5, %p612_p3 }
  0x1c   : > { %620 = shalt.err (!%p617_p7)
}
  0x1d   : > { %s621_s3 = scalar_lea.vmem %s804_s19, 2048  ;;  %p629_p2 = scmp.lt.s32.totalorder %s804_s19, %s804_s19 }
  0x1e   : > { %p622_p9 = scmp.ne.s32.totalorder %s804_s19, %s621_s3  ;;  %p630_p6 = scmp.lt.s32.totalorder %s621_s3, %s621_s3 }
  0x20   : > { %p624_p10 = pnand %p622_p9, %p610_p13  ;;  %p631_p4 = por %p630_p6, %p629_p2 }
  0x22   : > { %p625_p1 = pneg %p624_p10 }
  0x24   : > { %p632_p8 = pnand %p631_p4, %p625_p1 }
  0x26   : > { %635 = shalt.err (!%p632_p8)
}
  0x27   : > { %s739_s4 = smov 128   ;;  %s740_s5 = smov 8  }
  0x28   : > { %558 = dma.hbm_to_vmem [thread:$0]  (!%p811_p11), %s982_s1, 2048, %s804_s19, [#allocation6], %s739_s4, %s739_s4, %s740_s5  }
  0x29   : > { %p24_p1 = scmp.eq.s32.totalorder %s23_s23, 0  ;;  %p33_p2 = scmp.ne.s32.totalorder %s732_s11, %s728_s10 }
  0x2a   : > { %p34_p4 = scmp.eq.s32.totalorder %s736_s12, 0  ;;  %p568_p6 = scmp.lt.s32.totalorder %s736_s12, 2 }
  0x2b   : > { %s850_s8 = scalar_select %p24_p1, %s732_s11, %s26_s22  }
  0x2c   : > { %p35_p8 = por %p34_p4, %p33_p2  ;;  %p991_p10 = scmp.eq.s32.totalorder %s781_s13, 1 }
  0x2d   : > { %s123_s18 = sand.u32 1, %s732_s11   ;;  %s429_s20 = sshll.u32 %s736_s12, 10 }
  0x2e   : > { %p854_p12 = por %p991_p10, %p33_p2  ;;  %s417_s24 = sshll.u32 %s123_s18, 6 }
  0x2f   : > { %s863_s27 = scalar_lea.hbm %s981_s0, %s429_s20  ;;  %s127_s19 = scalar_lea.vmem [#allocation2], %s417_s24 }
  0x30   : > { %s134_s22 = sshll.u32 %s127_s19, 4  ;;  %p865_p11 = pnand %p568_p6, %p35_p8  ;;  %s869_s22 = int_to_ptr.vmem [resolvable:$true] %s134_s22 }
  0x31   : > { %s871_s28 = scalar_lea.sflag [#allocation3], %s123_s18  ;;  %s636_s29 = scalar_lea.hbm %s863_s27, 1024 }
  0x32   : > { %p637_p13 = scmp.ne.s32.totalorder %s863_s27, %s636_s29  ;;  %p638_p0 = pneg %p865_p11 }
  0x33   : > { %s641_s6 = scalar_lea.hbm %s981_s0, 2048  ;;  %p642_p7 = scmp.lt.u32.totalorder %s863_s27, %s981_s0 }
  0x34   : > { %p639_p3 = pnand %p638_p0, %p637_p13  ;;  %p643_p9 = scmp.lt.u32.totalorder %s641_s6, %s636_s29 }
  0x35   : > { %p645_p2 = scmp.lt.u32.totalorder %s636_s29, %s863_s27 }
  0x36   : > { %p640_p5 = pneg %p639_p3  ;;  %p644_p1 = por %p643_p9, %p642_p7 }
  0x38   : > { %p646_p4 = por %p645_p2, %p644_p1 }
  0x3a   : > { %p647_p6 = pnand %p646_p4, %p640_p5 }
  0x3c   : > { %650 = shalt.err (!%p647_p6)
}
  0x3d   : > { %s651_s18 = scalar_lea.vmem %s869_s22, 1024  ;;  %s741_s24 = smov [#allocation2]  }
  0x3e   : > { %p652_p8 = scmp.ne.s32.totalorder %s869_s22, %s651_s18  ;;  %s656_s25 = sshll.u32 %s741_s24, 4  ;;  %s657_s25 = int_to_ptr.vmem [resolvable:$false] %s656_s25 }
  0x3f   : > { %s658_s26 = scalar_lea.vmem %s657_s25, 2048  ;;  %p659_p3 = scmp.lt.s32.totalorder %s869_s22, %s657_s25 }
  0x40   : > { %p654_p10 = pnand %p652_p8, %p638_p0  ;;  %p660_p7 = scmp.lt.s32.totalorder %s658_s26, %s651_s18 }
  0x42   : > { %p655_p13 = pneg %p654_p10  ;;  %p661_p9 = por %p660_p7, %p659_p3 }
  0x44   : > { %p662_p1 = pnand %p661_p9, %p655_p13 }
  0x46   : > { %665 = shalt.err (!%p662_p1)
}
  0x47   : > { %562 = dma.hbm_to_vmem [thread:$0]  (!%p865_p11), %s863_s27, 1024, %s869_s22, %s871_s28, %s739_s4, %s739_s4, %s740_s5  }
  0x48   : > { %p994_p0 = scmp.ne.s32.totalorder %s989_s17, 0 }
  0x49   : > { %s905_s19 = sand.u32 (!%p994_p0), 1, %s728_s10   ;;  %p995_p5 = scmp.ne.s32.totalorder (!%p994_p0), %s987_s15, 0 }
  0x4a   : > { %146 = sbr.rel (%p994_p0) target bundleno = 352 (0x160), region = 28  ;;  %s421_s29 = sshll.u32 (!%p994_p0), %s905_s19, 6 }
  0x4b   : > { %s149_s30 = scalar_lea.sflag (!%p994_p0), [#allocation3], %s905_s19  ;;  %s911_s23 = scalar_lea.vmem (!%p994_p0), [#allocation2], %s421_s29 }
  0x51   : > { %711 = dma.done.wait (%p995_p5), %s149_s30, 1024  }
  0x52   : > { %713 = vsyncadd (%p995_p5), %s149_s30, 4294966272  ;;  %p996_p11 = scmp.eq.s32.totalorder %s781_s13, 0 }
  0x54   : > { %715 = dma.done.wait (%p996_p11), [#allocation6], 2048   ;;  %p997_p2 = pmov %p996_p11 }
  0x55   : > { %v187_v0 = vld [vmem:[#allocation5] sm:$0xff]  ;;  %v188_v1 = vld [vmem:[#allocation5 + $0x8] sm:$0xff]  ;;  %v189_v2 = vld [vmem:[#allocation5 + $0x10] sm:$0xff]  ;;  %s176_s15 = scalar_lea.vmem [#allocation7], %s421_s29  ;;  %s430_s4 = sshll.u32 %s781_s13, 10 }
  0x56   : > { %717 = vsyncadd (%p997_p2), [#allocation6], 4294965248  ;;  %v499_v3 = vpack.c.bf16 %v188_v1, %v187_v0  ;;  %v190_v4 = vld [vmem:[#allocation5 + $0x18] sm:$0xff]  ;;  %v191_v6 = vld [vmem:[#allocation5 + $0x20] sm:$0xff]  ;;  %s330_s17 = sshll.u32 %s176_s15, 4  ;;  %s937_s22 = scalar_lea.hbm %s983_s2, %s430_s4  ;;  %s932_s17 = int_to_ptr.vmem [resolvable:$true] %s330_s17 }
  0x57   : > { %v503_v5 = vpack.c.bf16 %v190_v4, %v189_v2  ;;  %v192_v7 = vld [vmem:[#allocation5 + $0x28] sm:$0xff]  ;;  %v179_v9 = vld [vmem:[%s911_s23] sm:$0xff]  ;;  %v193_v11 = vld [vmem:[#allocation5 + $0x30] sm:$0xff]  ;;  %s317_s13 = scalar_lea.sflag [#allocation4], %s905_s19  ;;  %s666_s28 = scalar_lea.vmem %s932_s17, 1024 }
  0x58   : > { %500 = vmatprep.subr.bf16.mxu0 %v499_v3  ;;  %531 = vmatprep.subr.bf16.mxu1 %v499_v3  ;;  %v507_v8 = vpack.c.bf16 %v192_v7, %v191_v6  ;;  %v183_v10 = vld [vmem:[%s911_s23 + $0x20] sm:$0xff]  ;;  %v194_v12 = vld [vmem:[#allocation5 + $0x38] sm:$0xff]  ;;  %v196_v15 = vld [vmem:[#allocation5 + $0x48] sm:$0xff]  ;;  %p667_p4 = scmp.ne.s32.totalorder %s932_s17, %s666_s28  ;;  %s742_s3 = smov [#allocation7]  }
  0x59   : > { %502 = vmatpush3.bf16.msra.mxu0 %v499_v3  ;;  %539 = vmatpush3.bf16.msra.mxu1 %v499_v3  ;;  %v511_v13 = vpack.c.bf16 %v194_v12, %v193_v11  ;;  %v195_v14 = vld [vmem:[#allocation5 + $0x40] sm:$0xff]  ;;  %v197_v17 = vld [vmem:[#allocation5 + $0x50] sm:$0xff]  ;;  %v198_v18 = vld [vmem:[#allocation5 + $0x58] sm:$0xff]  ;;  %s670_s6 = sshll.u32 %s742_s3, 4  ;;  %s671_s6 = int_to_ptr.vmem [resolvable:$false] %s670_s6 }
  0x5a   : > { %504 = vmatprep.subr.bf16.mxu0 %v503_v5  ;;  %532 = vmatprep.subr.bf16.mxu1 %v503_v5  ;;  %v515_v16 = vpack.c.bf16 %v196_v15, %v195_v14  ;;  %v519_v19 = vpack.c.bf16 %v198_v18, %v197_v17  ;;  %v199_v20 = vld [vmem:[#allocation5 + $0x60] sm:$0xff]  ;;  %v200_v21 = vld [vmem:[#allocation5 + $0x68] sm:$0xff]  ;;  %v201_v23 = vld [vmem:[#allocation5 + $0x70] sm:$0xff]  ;;  %p668_p6 = pnand %p667_p4, %p854_p12  ;;  %s672_s7 = scalar_lea.vmem %s671_s6, 2048 }
  0x5b   : > { %487 = vmatprep.mubr.f32.mxu0 %v179_v9  ;;  %493 = vmatprep.mubr.f32.mxu1 %v183_v10  ;;  %v523_v22 = vpack.c.bf16 %v200_v21, %v199_v20  ;;  %v202_v24 = vld [vmem:[#allocation5 + $0x78] sm:$0xff]  ;;  %v180_v26 = vld [vmem:[%s911_s23 + $0x8] sm:$0xff]  ;;  %v181_v28 = vld [vmem:[%s911_s23 + $0x10] sm:$0xff]  ;;  %p673_p10 = scmp.lt.s32.totalorder %s932_s17, %s671_s6  ;;  %p674_p13 = scmp.lt.s32.totalorder %s672_s7, %s666_s28 }
  0x5c   : > { %v527_v25 = vpack.c.bf16 %v202_v24, %v201_v23  ;;  %v184_v27 = vld [vmem:[%s911_s23 + $0x28] sm:$0xff]  ;;  %v185_v29 = vld [vmem:[%s911_s23 + $0x30] sm:$0xff]  ;;  %v182_v30 = vld [vmem:[%s911_s23 + $0x18] sm:$0xff]  ;;  %p669_p8 = pneg %p668_p6 }
  0x5d   : > { %506 = vmatpush3.bf16.msra.mxu0 %v503_v5  ;;  %540 = vmatpush3.bf16.msra.mxu1 %v503_v5  ;;  %v186_v31 = vld [vmem:[%s911_s23 + $0x38] sm:$0xff]  ;;  %p675_p3 = por %p674_p13, %p673_p10 }
  0x5e   : > { %508 = vmatprep.subr.bf16.mxu0 %v507_v8  ;;  %533 = vmatprep.subr.bf16.mxu1 %v507_v8 }
  0x5f   : > { %p676_p7 = pnand %p675_p3, %p669_p8 }
  0x61   : > { %510 = vmatpush3.bf16.msra.mxu0 %v507_v8  ;;  %541 = vmatpush3.bf16.msra.mxu1 %v507_v8 }
  0x62   : > { %512 = vmatprep.subr.bf16.mxu0 %v511_v13  ;;  %534 = vmatprep.subr.bf16.mxu1 %v511_v13 }
  0x65   : > { %514 = vmatpush3.bf16.msra.mxu0 %v511_v13  ;;  %542 = vmatpush3.bf16.msra.mxu1 %v511_v13 }
  0x66   : > { %516 = vmatprep.subr.bf16.mxu0 %v515_v16  ;;  %535 = vmatprep.subr.bf16.mxu1 %v515_v16 }
  0x69   : > { %518 = vmatpush3.bf16.msra.mxu0 %v515_v16  ;;  %543 = vmatpush3.bf16.msra.mxu1 %v515_v16 }
  0x6a   : > { %520 = vmatprep.subr.bf16.mxu0 %v519_v19  ;;  %536 = vmatprep.subr.bf16.mxu1 %v519_v19 }
  0x6d   : > { %522 = vmatpush3.bf16.msra.mxu0 %v519_v19  ;;  %544 = vmatpush3.bf16.msra.mxu1 %v519_v19 }
  0x6e   : > { %524 = vmatprep.subr.bf16.mxu0 %v523_v22  ;;  %537 = vmatprep.subr.bf16.mxu1 %v523_v22 }
  0x71   : > { %526 = vmatpush3.bf16.msra.mxu0 %v523_v22  ;;  %545 = vmatpush3.bf16.msra.mxu1 %v523_v22 }
  0x72   : > { %528 = vmatprep.subr.bf16.mxu0 %v527_v25  ;;  %538 = vmatprep.subr.bf16.mxu1 %v527_v25 }
  0x75   : > { %530 = vmatpush3.bf16.msra.mxu0 %v527_v25  ;;  %546 = vmatpush3.bf16.msra.mxu1 %v527_v25 }
  0x78   : > { %488 = vmatmul.mubr.f32.vlgmr.msra.gmra.mrb[0].mxu0 %v180_v26  ;;  %494 = vmatmul.mubr.f32.vlgmr.msra.gmra.mrb[0].mxu1 %v184_v27 }
  0x79   : > { %490 = vmatprep.mubr.f32.mxu0 %v181_v28  ;;  %496 = vmatprep.mubr.f32.mxu1 %v185_v29 }
  0x7c   : > { %491 = vmatmul.mubr.f32.gmra.mrb[2].mxu0 %v182_v30  ;;  %497 = vmatmul.mubr.f32.gmra.mrb[2].mxu1 %v186_v31 }
 0x14b   : > { %v489_v32 = vpop.f32.mrb[0].mxu0  ;;  %v495_v33 = vpop.f32.mrb[0].mxu1 }
 0x14c   : > { %309 = vst [vmem:[%s176_s15 + $0x8] sm:$0xff] %v489_v32  ;;  %313 = vst [vmem:[%s176_s15 + $0x28] sm:$0xff] %v495_v33  ;;  %v269_v34 = vpop.f32.mrb[1].mxu0  ;;  %v289_v35 = vpop.f32.mrb[1].mxu1 }
 0x14d   : > { %308 = vst [vmem:[%s176_s15] sm:$0xff] %v269_v34  ;;  %312 = vst [vmem:[%s176_s15 + $0x20] sm:$0xff] %v289_v35 }
 0x14f   : > { %v492_v36 = vpop.f32.mrb[2].mxu0  ;;  %v498_v37 = vpop.f32.mrb[2].mxu1 }
 0x150   : > { %311 = vst [vmem:[%s176_s15 + $0x18] sm:$0xff] %v492_v36  ;;  %315 = vst [vmem:[%s176_s15 + $0x38] sm:$0xff] %v498_v37  ;;  %v279_v38 = vpop.f32.mrb[3].mxu0  ;;  %v299_v39 = vpop.f32.mrb[3].mxu1 }
 0x151   : > { %310 = vst [vmem:[%s176_s15 + $0x10] sm:$0xff] %v279_v38  ;;  %314 = vst [vmem:[%s176_s15 + $0x30] sm:$0xff] %v299_v39 }
 0x152   : > { %679 = shalt.err (!%p676_p7)
}
 0x153   : > { %s680_s20 = scalar_lea.hbm %s937_s22, 1024  ;;  %s684_s25 = scalar_lea.hbm %s983_s2, 2048 }
 0x154   : > { %p681_p9 = scmp.ne.s32.totalorder %s937_s22, %s680_s20  ;;  %p685_p5 = scmp.lt.u32.totalorder %s937_s22, %s983_s2 }
 0x155   : > { %p686_p11 = scmp.lt.u32.totalorder %s684_s25, %s680_s20  ;;  %p688_p4 = scmp.lt.u32.totalorder %s680_s20, %s937_s22 }
 0x156   : > { %p682_p1 = pnand %p681_p9, %p854_p12 }
 0x157   : > { %p687_p2 = por %p686_p11, %p685_p5 }
 0x158   : > { %p683_p0 = pneg %p682_p1 }
 0x159   : > { %p689_p6 = por %p688_p4, %p687_p2 }
 0x15b   : > { %p690_p8 = pnand %p689_p6, %p683_p0 }
 0x15d   : > { %693 = shalt.err (!%p690_p8)
}
 0x15e   : > { %s743_s30 = smov 128   ;;  %s744_s23 = smov 8  }
 0x15f   : > { %553 = dma.vmem_to_hbm [thread:$0]  (%p854_p12), %s932_s17, 1024, %s937_s22, %s317_s13, %s743_s30, %s743_s30, %s744_s23  }
 0x160 PF: > { %s345_s15 = sand.u32 1, %s724_s9   ;;  %p998_p10 = scmp.ne.s32.totalorder %s988_s16, 0 }
 0x161   : > { %p999_p13 = scmp.ge.s32.totalorder %s736_s12, 2  ;;  %s346_s4 = scalar_lea.sflag [#allocation4], %s345_s15 }
 0x163   : > { %p564_p3 = pnand %p999_p13, %p998_p10 }
 0x165   : > { %719 = dma.done.wait (!%p564_p3), %s346_s4, 1024  }
 0x166   : > { %721 = vsyncadd (!%p564_p3), %s346_s4, 4294966272  ;;  %p16_p7 = scmp.ge.s32.totalorder %s816_s21, 4   ;;  %s1000_s9 = smov %s728_s10 }
 0x167   : > { %s1001_s10 = smov %s732_s11  ;;  %s1002_s11 = smov %s850_s8 }
 0x168   : > { %s1003_s12 = smov %s816_s21  ;;  %18 = sbr.rel (!%p16_p7) target bundleno = 6 (0x6), region = 77 }
 0x16f   :  { %351 = vsyncpa [#allocation3], 1 }
 0x170   :  { %353 = vsyncpa [#allocation3 + $0x1], 1 }
 0x171   :  { %354 = vsyncpa [#allocation6], 1 }
 0x172   :  { %355 = vsyncpa [#allocation4], 1 }
 0x173   :  { %357 = vsyncpa [#allocation4 + $0x1], 1 }

</bundles_post_ra>
